<compile_context>
chip_gen: v5e
topology: v5e:2x2
jax: 0.10.0
libtpu: 0.0.40
codegen_flags: <defaults>
</compile_context>

<pallas_src>
import functools
import numpy as np
import jax
import jax.numpy as jnp
from jax import lax
from jax.experimental import pallas as pl
from jax.experimental.pallas import tpu as pltpu

DEFAULT_TILE_N = 2048  # anchors per grid step (lane axis); multiple of 128


def _round_up(x, m):
    return ((x + m - 1) // m) * m


def _anchor_sampler_kernel(anchors_t_ref, gt_h_ref, gt_r_t_ref,
                           labels_ref, states_ref, tboxes_ref,
                           *, class_num, pos_th, neg_th):
    # anchors_t_ref : (4, TILE_N)  [x1; y1; x2; y2], one coordinate per sublane row
    # gt_h_ref      : (G, 4)       horizontal GT boxes
    # gt_r_t_ref    : (R, G)       rotated GT boxes transposed (last row = class label)
    anchors_t = anchors_t_ref[...]
    gt_h = gt_h_ref[...]
    gt_r_t = gt_r_t_ref[...]
    tn = anchors_t.shape[1]
    g = gt_h.shape[0]
    r = gt_r_t.shape[0]

    ax1 = anchors_t[0:1, :]          # (1, TILE_N)
    ay1 = anchors_t[1:2, :]
    ax2 = anchors_t[2:3, :]
    ay2 = anchors_t[3:4, :]
    gx1 = gt_h[:, 0:1]               # (G, 1)
    gy1 = gt_h[:, 1:2]
    gx2 = gt_h[:, 2:3]
    gy2 = gt_h[:, 3:4]

    # cython bbox_overlaps convention (+1 pixel widths/heights).
    # All intermediates are (G, TILE_N): lane-dense VALU work, anchors on the lane axis.
    iw = jnp.minimum(ax2, gx2) - jnp.maximum(ax1, gx1) + 1.0
    ih = jnp.minimum(ay2, gy2) - jnp.maximum(ay1, gy1) + 1.0
    iw = jnp.maximum(iw, 0.0)
    ih = jnp.maximum(ih, 0.0)
    inter = iw * ih                                               # (G, TILE_N)
    area_a = (ax2 - ax1 + 1.0) * (ay2 - ay1 + 1.0)                # (1, TILE_N)
    area_g = (gx2 - gx1 + 1.0) * (gy2 - gy1 + 1.0)                # (G, 1)
    ua = area_a + area_g - inter                                  # (G, TILE_N)
    # reciprocal keeps the divide off the VALU; approx=False to preserve argmax/threshold parity
    overlaps = jnp.where(inter > 0.0, inter * pl.reciprocal(ua, approx=False), 0.0)

    # per-anchor max IoU + index of first maximum (== torch.argmax tie-breaking)
    iota_g = lax.broadcasted_iota(jnp.int32, (g, tn), 0)
    max_ov = jnp.max(overlaps, axis=0, keepdims=True)             # (1, TILE_N)
    amax = jnp.min(jnp.where(overlaps == max_ov, iota_g, g),
                   axis=0, keepdims=True)                         # (1, TILE_N) int32

    # gather target_boxes = gt_boxes_r[argmax] via one-hot MXU matmul, lane-dense result
    onehot = (iota_g == amax).astype(jnp.float32)                 # (G, TILE_N)
    target_t = jnp.dot(gt_r_t, onehot,
                       preferred_element_type=jnp.float32)        # (R, TILE_N)

    positive = max_ov >= pos_th                                   # (1, TILE_N) bool
    ignore = (max_ov > neg_th) & jnp.logical_not(positive)
    states = jnp.where(positive, 1.0, jnp.where(ignore, -1.0, 0.0))

    cls_idx = target_t[r - 1:r, :].astype(jnp.int32)              # (1, TILE_N)
    # (idx - 1) with wrap-around, matching torch negative-index semantics for idx == 0
    lbl_idx = jnp.mod(cls_idx - 1, class_num)
    iota_c = lax.broadcasted_iota(jnp.int32, (class_num, tn), 0)
    labels = (iota_c == lbl_idx) & positive                       # (CLASS_NUM, TILE_N)

    labels_ref[...] = labels.astype(jnp.float32)
    states_ref[...] = states.astype(jnp.float32)
    tboxes_ref[...] = target_t


def anchor_sampler_rsdet(gt_boxes_h, gt_boxes_r, anchors, *,
                         class_num, pos_th=0.5, neg_th=0.4, tile_n=DEFAULT_TILE_N):
    """Returns (labels (N,C), anchor_states (N,), target_boxes (N,R)) like the torch module."""
    n = anchors.shape[0]
    g = gt_boxes_r.shape[0]
    r = gt_boxes_r.shape[1]

    if g == 0:  # matches the torch fall-through branch
        return (jnp.zeros((n, class_num), jnp.float32),
                jnp.zeros((n,), jnp.float32),
                jnp.zeros((n, r), jnp.float32))

    tile = min(tile_n, _round_up(n, 128))        # lane-axis tile, multiple of 128
    n_pad = _round_up(n, tile)

    anchors_t = jnp.transpose(
        jnp.pad(anchors.astype(jnp.float32), ((0, n_pad - n), (0, 0))))     # (4, n_pad)
    gt_h = gt_boxes_h[:, :4].astype(jnp.float32)                            # (G, 4)
    gt_r_t = jnp.transpose(gt_boxes_r.astype(jnp.float32))                  # (R, G)

    kernel = functools.partial(_anchor_sampler_kernel,
                               class_num=class_num, pos_th=pos_th, neg_th=neg_th)

    # VMEM: double-buffered per-tile I/O + ~a dozen (G, tile) f32 intermediates, with headroom;
    # clamped so it stays within v7x's 64 MiB physical VMEM.
    vmem_bytes = 4 * tile * (2 * 4 + 2 * (class_num + 1 + r) + 16 * g) + (2 << 20)
    vmem_bytes = int(min(max(vmem_bytes, 8 << 20), 48 << 20))

    cost = pl.CostEstimate(
        flops=int(n_pad * g * 12 + 2 * n_pad * g * r),
        transcendentals=int(n_pad * g),
        bytes_accessed=int(4 * (n_pad * 4 + g * 4 + g * r
                                + n_pad * (class_num + 1 + r))))

    labels_t, states, tboxes_t = pl.pallas_call(
        kernel,
        out_shape=(jax.ShapeDtypeStruct((class_num, n_pad), jnp.float32),
                   jax.ShapeDtypeStruct((1, n_pad), jnp.float32),
                   jax.ShapeDtypeStruct((r, n_pad), jnp.float32)),
        grid_spec=pltpu.PrefetchScalarGridSpec(
            num_scalar_prefetch=0,
            grid=(n_pad // tile,),
            in_specs=[pl.BlockSpec((4, tile), lambda i: (0, i)),
                      pl.BlockSpec((g, 4), lambda i: (0, 0)),
                      pl.BlockSpec((r, g), lambda i: (0, 0))],
            out_specs=[pl.BlockSpec((class_num, tile), lambda i: (0, i)),
                       pl.BlockSpec((1, tile), lambda i: (0, i)),
                       pl.BlockSpec((r, tile), lambda i: (0, i))]),
        compiler_params=pltpu.CompilerParams(
            dimension_semantics=("parallel",),
            vmem_limit_bytes=vmem_bytes),
        cost_estimate=cost,
    )(anchors_t, gt_h, gt_r_t)

    return (jnp.transpose(labels_t)[:n],
            states[0, :n],
            jnp.transpose(tboxes_t)[:n])


def _reference(gt_boxes_h, gt_boxes_r, anchors, *, class_num, pos_th=0.5, neg_th=0.4):
    # pure-JAX mirror of the torch forward (float32 instead of float64 IoU)
    a = anchors.astype(jnp.float32)
    gh = gt_boxes_h[:, :4].astype(jnp.float32)
    gr = gt_boxes_r.astype(jnp.float32)
    iw = jnp.minimum(a[:, None, 2], gh[None, :, 2]) - jnp.maximum(a[:, None, 0], gh[None, :, 0]) + 1.0
    ih = jnp.minimum(a[:, None, 3], gh[None, :, 3]) - jnp.maximum(a[:, None, 1], gh[None, :, 1]) + 1.0
    iw = jnp.maximum(iw, 0.0)
    ih = jnp.maximum(ih, 0.0)
    inter = iw * ih
    area_a = (a[:, 2] - a[:, 0] + 1.0) * (a[:, 3] - a[:, 1] + 1.0)
    area_g = (gh[:, 2] - gh[:, 0] + 1.0) * (gh[:, 3] - gh[:, 1] + 1.0)
    ua = area_a[:, None] + area_g[None, :] - inter
    ov = jnp.where(inter > 0.0, inter / ua, 0.0)
    amax = jnp.argmax(ov, axis=1)
    max_ov = jnp.max(ov, axis=1)
    target = gr[amax]
    positive = max_ov >= pos_th
    ignore = (max_ov > neg_th) & (~positive)
    states = jnp.where(positive, 1.0, jnp.where(ignore, -1.0, 0.0))
    idx = target[:, -1].astype(jnp.int32)
    lbl = jnp.mod(idx - 1, class_num)
    labels = (jnp.arange(class_num)[None, :] == lbl[:, None]) & positive[:, None]
    return labels.astype(jnp.float32), states.astype(jnp.float32), target


if __name__ == "__main__":
    key = jax.random.PRNGKey(0)
    N, G, CLASS_NUM, R = 256, 8, 5, 6
    k_ac, k_as, k_gc, k_gs, k_lab, k_th = jax.random.split(key, 6)

    # anchors: (N, 4) [x1, y1, x2, y2]
    a_ctr = jax.random.uniform(k_ac, (N, 2), minval=10.0, maxval=90.0)
    a_sz = jax.random.uniform(k_as, (N, 2), minval=5.0, maxval=30.0)
    anchors = jnp.concatenate([a_ctr - a_sz / 2, a_ctr + a_sz / 2], axis=1)

    # gt horizontal boxes: (G, 5) [x1, y1, x2, y2, label]
    g_ctr = jax.random.uniform(k_gc, (G, 2), minval=20.0, maxval=80.0)
    g_sz = jax.random.uniform(k_gs, (G, 2), minval=8.0, maxval=25.0)
    gt_labels = jax.random.randint(k_lab, (G, 1), 1, CLASS_NUM + 1).astype(jnp.float32)
    gt_boxes_h = jnp.concatenate([g_ctr - g_sz / 2, g_ctr + g_sz / 2, gt_labels], axis=1)

    # gt rotated boxes: (G, 6) [xc, yc, w, h, theta, label]
    theta = jax.random.uniform(k_th, (G, 1), minval=-90.0, maxval=0.0)
    gt_boxes_r = jnp.concatenate([g_ctr, g_sz, theta, gt_labels], axis=1)

    labels, states, tboxes = anchor_sampler_rsdet(
        gt_boxes_h, gt_boxes_r, anchors, class_num=CLASS_NUM, pos_th=0.5, neg_th=0.4)
    jax.block_until_ready((labels, states, tboxes))

    ref_labels, ref_states, ref_tboxes = _reference(
        gt_boxes_h, gt_boxes_r, anchors, class_num=CLASS_NUM, pos_th=0.5, neg_th=0.4)

    assert labels.shape == (N, CLASS_NUM) and states.shape == (N,) and tboxes.shape == (N, R)
    np.testing.assert_allclose(np.asarray(labels), np.asarray(ref_labels), atol=1e-5)
    np.testing.assert_allclose(np.asarray(states), np.asarray(ref_states), atol=1e-5)
    np.testing.assert_allclose(np.asarray(tboxes), np.asarray(ref_tboxes), atol=1e-4)

    print("KERNEL_OK")
</pallas_src>

<mosaic_0001>
module attributes {stable_mosaic.version = 11 : i64} {
  func.func @_anchor_sampler_kernel(%arg0: i32, %arg1: memref<4x256xf32, #tpu.memory_space<vmem>>, %arg2: memref<8x4xf32, #tpu.memory_space<vmem>>, %arg3: memref<6x8xf32, #tpu.memory_space<vmem>>, %arg4: memref<5x256xf32, #tpu.memory_space<vmem>>, %arg5: memref<1x256xf32, #tpu.memory_space<vmem>>, %arg6: memref<6x256xf32, #tpu.memory_space<vmem>>) attributes {dimension_semantics = [#tpu.dimension_semantics<parallel>], iteration_bounds = array<i64: 1>, scalar_prefetch = 0 : i64, scratch_operands = 0 : i64, tpu.core_type = #tpu.core_type<tc>, window_params = [{transform_indices = @transform_0, window_bounds = array<i64: 4, 256>}, {pipeline_mode = #tpu.pipeline_mode<synchronous>, transform_indices = @transform_1, window_bounds = array<i64: 8, 4>}, {pipeline_mode = #tpu.pipeline_mode<synchronous>, transform_indices = @transform_2, window_bounds = array<i64: 6, 8>}, {transform_indices = @transform_3, window_bounds = array<i64: 5, 256>}, {transform_indices = @transform_4, window_bounds = array<i64: 1, 256>}, {transform_indices = @transform_5, window_bounds = array<i64: 6, 256>}]} {
    %c0 = arith.constant 0 : index
    %c0_0 = arith.constant 0 : index
    %0 = vector.load %arg1[%c0, %c0_0] : memref<4x256xf32, #tpu.memory_space<vmem>>, vector<4x256xf32>
    %c0_1 = arith.constant 0 : index
    %c0_2 = arith.constant 0 : index
    %1 = vector.load %arg2[%c0_1, %c0_2] : memref<8x4xf32, #tpu.memory_space<vmem>>, vector<8x4xf32>
    %c0_3 = arith.constant 0 : index
    %c0_4 = arith.constant 0 : index
    %2 = vector.load %arg3[%c0_3, %c0_4] : memref<6x8xf32, #tpu.memory_space<vmem>>, vector<6x8xf32>
    %3 = vector.extract_strided_slice %0 {offsets = [0, 0], sizes = [1, 256], strides = [1, 1]} : vector<4x256xf32> to vector<1x256xf32>
    %4 = vector.extract_strided_slice %0 {offsets = [1, 0], sizes = [1, 256], strides = [1, 1]} : vector<4x256xf32> to vector<1x256xf32>
    %5 = vector.extract_strided_slice %0 {offsets = [2, 0], sizes = [1, 256], strides = [1, 1]} : vector<4x256xf32> to vector<1x256xf32>
    %6 = vector.extract_strided_slice %0 {offsets = [3, 0], sizes = [1, 256], strides = [1, 1]} : vector<4x256xf32> to vector<1x256xf32>
    %7 = vector.extract_strided_slice %1 {offsets = [0, 0], sizes = [8, 1], strides = [1, 1]} : vector<8x4xf32> to vector<8x1xf32>
    %8 = vector.extract_strided_slice %1 {offsets = [0, 1], sizes = [8, 1], strides = [1, 1]} : vector<8x4xf32> to vector<8x1xf32>
    %9 = vector.extract_strided_slice %1 {offsets = [0, 2], sizes = [8, 1], strides = [1, 1]} : vector<8x4xf32> to vector<8x1xf32>
    %10 = vector.extract_strided_slice %1 {offsets = [0, 3], sizes = [8, 1], strides = [1, 1]} : vector<8x4xf32> to vector<8x1xf32>
    %11 = vector.broadcast %5 : vector<1x256xf32> to vector<8x256xf32>
    %12 = vector.broadcast %9 : vector<8x1xf32> to vector<8x256xf32>
    %13 = arith.minimumf %11, %12 : vector<8x256xf32>
    %14 = vector.broadcast %3 : vector<1x256xf32> to vector<8x256xf32>
    %15 = vector.broadcast %7 : vector<8x1xf32> to vector<8x256xf32>
    %16 = arith.maximumf %14, %15 : vector<8x256xf32>
    %17 = arith.subf %13, %16 : vector<8x256xf32>
    %cst = arith.constant 1.000000e+00 : f32
    %18 = vector.broadcast %cst : f32 to vector<8x256xf32>
    %19 = arith.addf %17, %18 : vector<8x256xf32>
    %20 = vector.broadcast %6 : vector<1x256xf32> to vector<8x256xf32>
    %21 = vector.broadcast %10 : vector<8x1xf32> to vector<8x256xf32>
    %22 = arith.minimumf %20, %21 : vector<8x256xf32>
    %23 = vector.broadcast %4 : vector<1x256xf32> to vector<8x256xf32>
    %24 = vector.broadcast %8 : vector<8x1xf32> to vector<8x256xf32>
    %25 = arith.maximumf %23, %24 : vector<8x256xf32>
    %26 = arith.subf %22, %25 : vector<8x256xf32>
    %cst_5 = arith.constant 1.000000e+00 : f32
    %27 = vector.broadcast %cst_5 : f32 to vector<8x256xf32>
    %28 = arith.addf %26, %27 : vector<8x256xf32>
    %cst_6 = arith.constant 0.000000e+00 : f32
    %29 = vector.broadcast %cst_6 : f32 to vector<8x256xf32>
    %30 = arith.maximumf %19, %29 : vector<8x256xf32>
    %cst_7 = arith.constant 0.000000e+00 : f32
    %31 = vector.broadcast %cst_7 : f32 to vector<8x256xf32>
    %32 = arith.maximumf %28, %31 : vector<8x256xf32>
    %33 = arith.mulf %30, %32 : vector<8x256xf32>
    %34 = arith.subf %5, %3 : vector<1x256xf32>
    %cst_8 = arith.constant 1.000000e+00 : f32
    %35 = vector.broadcast %cst_8 : f32 to vector<1x256xf32>
    %36 = arith.addf %34, %35 : vector<1x256xf32>
    %37 = arith.subf %6, %4 : vector<1x256xf32>
    %cst_9 = arith.constant 1.000000e+00 : f32
    %38 = vector.broadcast %cst_9 : f32 to vector<1x256xf32>
    %39 = arith.addf %37, %38 : vector<1x256xf32>
    %40 = arith.mulf %36, %39 : vector<1x256xf32>
    %41 = arith.subf %9, %7 : vector<8x1xf32>
    %cst_10 = arith.constant 1.000000e+00 : f32
    %42 = vector.broadcast %cst_10 : f32 to vector<8x1xf32>
    %43 = arith.addf %41, %42 : vector<8x1xf32>
    %44 = arith.subf %10, %8 : vector<8x1xf32>
    %cst_11 = arith.constant 1.000000e+00 : f32
    %45 = vector.broadcast %cst_11 : f32 to vector<8x1xf32>
    %46 = arith.addf %44, %45 : vector<8x1xf32>
    %47 = arith.mulf %43, %46 : vector<8x1xf32>
    %48 = vector.broadcast %40 : vector<1x256xf32> to vector<8x256xf32>
    %49 = vector.broadcast %47 : vector<8x1xf32> to vector<8x256xf32>
    %50 = arith.addf %48, %49 : vector<8x256xf32>
    %51 = arith.subf %50, %33 : vector<8x256xf32>
    %cst_12 = arith.constant 0.000000e+00 : f32
    %52 = vector.broadcast %cst_12 : f32 to vector<8x256xf32>
    %53 = arith.cmpf ogt, %33, %52 : vector<8x256xf32>
    %54 = tpu.reciprocal %51 : vector<8x256xf32> -> vector<8x256xf32>
    %55 = arith.mulf %33, %54 : vector<8x256xf32>
    %cst_13 = arith.constant 0.000000e+00 : f32
    %56 = vector.broadcast %cst_13 : f32 to vector<8x256xf32>
    %57 = arith.select %53, %55, %56 : vector<8x256xi1>, vector<8x256xf32>
    %58 = tpu.iota {dimensions = array<i32: 0>} : vector<8x256xi32>
    %cst_14 = arith.constant dense<0xFF800000> : vector<256xf32>
    %59 = vector.multi_reduction <maximumf>, %57, %cst_14 [0] : vector<8x256xf32> to vector<256xf32>
    %60 = vector.shape_cast %59 : vector<256xf32> to vector<1x256xf32>
    %61 = vector.broadcast %60 : vector<1x256xf32> to vector<8x256xf32>
    %62 = arith.cmpf oeq, %57, %61 : vector<8x256xf32>
    %c8_i32 = arith.constant 8 : i32
    %63 = vector.broadcast %c8_i32 : i32 to vector<8x256xi32>
    %64 = arith.select %62, %58, %63 : vector<8x256xi1>, vector<8x256xi32>
    %cst_15 = arith.constant dense<2147483647> : vector<256xi32>
    %65 = vector.multi_reduction <minsi>, %64, %cst_15 [0] : vector<8x256xi32> to vector<256xi32>
    %66 = vector.shape_cast %65 : vector<256xi32> to vector<1x256xi32>
    %67 = vector.broadcast %66 : vector<1x256xi32> to vector<8x256xi32>
    %68 = arith.cmpi eq, %58, %67 : vector<8x256xi32>
    %69 = arith.extui %68 : vector<8x256xi1> to vector<8x256xi32>
    %70 = arith.sitofp %69 : vector<8x256xi32> to vector<8x256xf32>
    %cst_16 = arith.constant dense<0.000000e+00> : vector<6x256xf32>
    %71 = tpu.matmul %2, %70, %cst_16 {dimension_numbers = #tpu.dot_dimension_numbers<[1], [0], [0], [1], [0, 0, 1, 1], [], []>} : vector<6x8xf32>, vector<8x256xf32>, vector<6x256xf32> -> vector<6x256xf32>
    %cst_17 = arith.constant 5.000000e-01 : f32
    %72 = vector.broadcast %cst_17 : f32 to vector<1x256xf32>
    %73 = arith.cmpf oge, %60, %72 : vector<1x256xf32>
    %cst_18 = arith.constant 4.000000e-01 : f32
    %74 = vector.broadcast %cst_18 : f32 to vector<1x256xf32>
    %75 = arith.cmpf ogt, %60, %74 : vector<1x256xf32>
    %cst_19 = arith.constant dense<true> : vector<1x256xi1>
    %76 = arith.xori %73, %cst_19 : vector<1x256xi1>
    %77 = arith.andi %75, %76 : vector<1x256xi1>
    %cst_20 = arith.constant -1.000000e+00 : f32
    %cst_21 = arith.constant 0.000000e+00 : f32
    %78 = vector.broadcast %cst_20 : f32 to vector<1x256xf32>
    %79 = vector.broadcast %cst_21 : f32 to vector<1x256xf32>
    %80 = arith.select %77, %78, %79 : vector<1x256xi1>, vector<1x256xf32>
    %cst_22 = arith.constant 1.000000e+00 : f32
    %81 = vector.broadcast %cst_22 : f32 to vector<1x256xf32>
    %82 = arith.select %73, %81, %80 : vector<1x256xi1>, vector<1x256xf32>
    %83 = vector.extract_strided_slice %71 {offsets = [5, 0], sizes = [1, 256], strides = [1, 1]} : vector<6x256xf32> to vector<1x256xf32>
    %84 = arith.fptosi %83 : vector<1x256xf32> to vector<1x256xi32>
    %c1_i32 = arith.constant 1 : i32
    %85 = vector.broadcast %c1_i32 : i32 to vector<1x256xi32>
    %86 = arith.subi %84, %85 : vector<1x256xi32>
    %c5_i32 = arith.constant 5 : i32
    %c0_i32 = arith.constant 0 : i32
    %87 = arith.cmpi eq, %c5_i32, %c0_i32 : i32
    %c1_i32_23 = arith.constant 1 : i32
    %88 = arith.select %87, %c1_i32_23, %c5_i32 : i32
    %89 = vector.broadcast %88 : i32 to vector<1x256xi32>
    %90 = arith.remsi %86, %89 : vector<1x256xi32>
    %c0_i32_24 = arith.constant 0 : i32
    %91 = vector.broadcast %c0_i32_24 : i32 to vector<1x256xi32>
    %92 = arith.cmpi ne, %90, %91 : vector<1x256xi32>
    %c0_i32_25 = arith.constant 0 : i32
    %93 = vector.broadcast %c0_i32_25 : i32 to vector<1x256xi32>
    %94 = arith.cmpi slt, %90, %93 : vector<1x256xi32>
    %c0_i32_26 = arith.constant 0 : i32
    %95 = arith.cmpi slt, %88, %c0_i32_26 : i32
    %96 = vector.broadcast %95 : i1 to vector<1x256xi1>
    %97 = vector.broadcast %96 : vector<1x256xi1> to vector<1x256xi1>
    %98 = arith.xori %94, %97 : vector<1x256xi1>
    %99 = arith.andi %98, %92 : vector<1x256xi1>
    %100 = vector.broadcast %88 : i32 to vector<1x256xi32>
    %101 = arith.addi %90, %100 : vector<1x256xi32>
    %102 = arith.select %99, %101, %90 : vector<1x256xi1>, vector<1x256xi32>
    %103 = tpu.iota {dimensions = array<i32: 0>} : vector<5x256xi32>
    %104 = vector.broadcast %102 : vector<1x256xi32> to vector<5x256xi32>
    %105 = arith.cmpi eq, %103, %104 : vector<5x256xi32>
    %106 = vector.broadcast %73 : vector<1x256xi1> to vector<5x256xi1>
    %107 = arith.andi %105, %106 : vector<5x256xi1>
    %108 = arith.extui %107 : vector<5x256xi1> to vector<5x256xi32>
    %109 = arith.sitofp %108 : vector<5x256xi32> to vector<5x256xf32>
    %c0_27 = arith.constant 0 : index
    %c0_28 = arith.constant 0 : index
    %110 = vector.load %arg4[%c0_27, %c0_28] : memref<5x256xf32, #tpu.memory_space<vmem>>, vector<5x256xf32>
    tpu.vector_store %arg4[%c0_27, %c0_28], %109 {strides = array<i32>} : memref<5x256xf32, #tpu.memory_space<vmem>>, vector<5x256xf32>,
    %c0_29 = arith.constant 0 : index
    %c0_30 = arith.constant 0 : index
    %111 = vector.load %arg5[%c0_29, %c0_30] : memref<1x256xf32, #tpu.memory_space<vmem>>, vector<1x256xf32>
    tpu.vector_store %arg5[%c0_29, %c0_30], %82 {strides = array<i32>} : memref<1x256xf32, #tpu.memory_space<vmem>>, vector<1x256xf32>,
    %c0_31 = arith.constant 0 : index
    %c0_32 = arith.constant 0 : index
    %112 = vector.load %arg6[%c0_31, %c0_32] : memref<6x256xf32, #tpu.memory_space<vmem>>, vector<6x256xf32>
    tpu.vector_store %arg6[%c0_31, %c0_32], %71 {strides = array<i32>} : memref<6x256xf32, #tpu.memory_space<vmem>>, vector<6x256xf32>,
    return
  }
  func.func @transform_0(%arg0: i32) -> (i32, i32) {
    %c0_i32 = arith.constant 0 : i32
    %c0_i32_0 = arith.constant 0 : i32
    return %c0_i32, %arg0 : i32, i32
  }
  func.func @transform_1(%arg0: i32) -> (i32, i32) {
    %c0_i32 = arith.constant 0 : i32
    %c0_i32_0 = arith.constant 0 : i32
    %c0_i32_1 = arith.constant 0 : i32
    return %c0_i32, %c0_i32_0 : i32, i32
  }
  func.func @transform_2(%arg0: i32) -> (i32, i32) {
    %c0_i32 = arith.constant 0 : i32
    %c0_i32_0 = arith.constant 0 : i32
    %c0_i32_1 = arith.constant 0 : i32
    return %c0_i32, %c0_i32_0 : i32, i32
  }
  func.func @transform_3(%arg0: i32) -> (i32, i32) {
    %c0_i32 = arith.constant 0 : i32
    %c0_i32_0 = arith.constant 0 : i32
    return %c0_i32, %arg0 : i32, i32
  }
  func.func @transform_4(%arg0: i32) -> (i32, i32) {
    %c0_i32 = arith.constant 0 : i32
    %c0_i32_0 = arith.constant 0 : i32
    return %c0_i32, %arg0 : i32, i32
  }
  func.func @transform_5(%arg0: i32) -> (i32, i32) {
    %c0_i32 = arith.constant 0 : i32
    %c0_i32_0 = arith.constant 0 : i32
    return %c0_i32, %arg0 : i32, i32
  }
}

</mosaic_0001>

<bundles_post_ra>
// kernel: tpu_custom_call.1
= control target key start
LH: loop header
LB: loop body
LE: loop exit
PB: predicated region body
PF: predicated region fallthrough
CT: control target
= control target key end

     0   :  { %11 = vsyncpa [#allocation3], 0  ;;  %s665_s0 = inlined_call_operand.vmem [shape: f32[4,256], index: 0, kind: input, shape index: {}]   ;;  %s666_s1 = inlined_call_operand.vmem [shape: f32[8,4], index: 1, kind: input, shape index: {}]   ;;  %s667_s2 = inlined_call_operand.hbm [shape: f32[6,8], index: 2, kind: input, shape index: {}]   ;;  %s668_s3 = inlined_call_operand.hbm [shape: f32[5,256], index: 3, kind: output, shape index: {0}]   ;;  %s669_s4 = inlined_call_operand.hbm [shape: f32[1,256], index: 4, kind: output, shape index: {1}]   ;;  %s670_s5 = inlined_call_operand.hbm [shape: f32[6,256], index: 5, kind: output, shape index: {2}]  }
   0x1   :  { %12 = vsyncpa [#allocation4], 0 }
   0x2   :  { %13 = vsyncpa [#allocation7], 0  ;;  %s23_s20 = sshll.u32 %s667_s2, 4  ;;  %s561_s21 = smov [#allocation2]   ;;  %s24_s20 = int_to_ptr.hbm [resolvable:$true] %s23_s20 }
   0x3   :  { %s25_s22 = sshll.u32 %s561_s21, 4  ;;  %s26_s22 = int_to_ptr.vmem [resolvable:$true] %s25_s22 }
   0x4   :  { %28 = dma.hbm_to_vmem [thread:$0]  %s24_s20, 128, %s26_s22, [#allocation3]  }
   0x5   :  { %555 = dma.done.wait [#allocation3], 128  }
   0x6   :  { %556 = vsyncadd [#allocation3], 4294967168  ;;  %v34_v0 = vld [vmem:[%s666_s1] sm:$0xff]  ;;  %s562_s25 = smov 2   ;;  %v563_v1 = vmov 2   ;;  %v564_v2 = vmov 3  }
   0x7   :  { %109 = vrot.lane.b32.xlu0 %v34_v0, %s562_s25  ;;  %450 = vset.pattern.permute.xlu1 %v563_v1  ;;  %v565_v3 = vmov 0   ;;  %s566_s2 = smov 127   ;;  %v567_v7 = vmov 1   ;;  %v33_v12 = vld [vmem:[%s665_s0] sm:$0xff]  ;;  %s386_s28 = sshll.u32 %s669_s4, 4  ;;  %s387_s28 = int_to_ptr.hbm [resolvable:$true] %s386_s28 }
   0x8   :  { %452 = vset.pattern.permute.xlu2 %v564_v2  ;;  %45 = vperm.xlu1 %450, %v34_v0   ;;  %v100_v13 = vrot.slane %v33_v12, 6  ;;  %v66_v14 = vperm.slane %v33_v12, 3  ;;  %v37_v15 = vperm.slane %v33_v12, 2  ;;  %v38_v16 = vperm.slane %v33_v12, 6  ;;  %s571_s29 = smov [#allocation6]   ;;  %s572_s6 = smov [#allocation8]  }
   0x9   :  { %73 = vperm.xlu2 %452, %v34_v0   ;;  %454 = vset.pattern.permute.xlu0 %v563_v1  ;;  %v50_v17 = vperm.slane %v33_v12, 0  ;;  %v51_v18 = vperm.slane %v33_v12, 4  ;;  %v67_v19 = vperm.slane %v33_v12, 7  ;;  %v78_v20 = vperm.slane %v33_v12, 1  ;;  %s384_s30 = sshll.u32 %s571_s29, 4  ;;  %s395_s7 = sshll.u32 %s572_s6, 4  ;;  %s385_s30 = int_to_ptr.vmem [resolvable:$true] %s384_s30  ;;  %s396_s7 = int_to_ptr.vmem [resolvable:$true] %s395_s7 }
   0xa   :  { %v79_v21 = vperm.slane %v33_v12, 5  ;;  %v102_v22 = vsub.f32 %v33_v12, %v100_v13  ;;  %v70_v23 = vperm.slane %v66_v14, 3  ;;  %v41_v24 = vperm.slane %v37_v15, 2  ;;  %s397_s10 = sshll.u32 %s670_s5, 4  ;;  %s573_s4 = smov [#allocation5]   ;;  %s398_s10 = int_to_ptr.hbm [resolvable:$true] %s397_s10 }
   0xb   :  { %v42_v25 = vperm.slane %v38_v16, 2  ;;  %v54_v26 = vperm.slane %v50_v17, 0  ;;  %v55_v27 = vperm.slane %v51_v18, 0  ;;  %v71_v28 = vperm.slane %v67_v19, 3  ;;  %s373_s5 = sshll.u32 %s573_s4, 4  ;;  %s375_s13 = sshll.u32 %s668_s3, 4  ;;  %s374_s5 = int_to_ptr.vmem [resolvable:$true] %s373_s5  ;;  %s376_s13 = int_to_ptr.hbm [resolvable:$true] %s375_s13 }
   0xc   :  { %v82_v29 = vperm.slane %v78_v20, 1  ;;  %v83_v30 = vperm.slane %v79_v21, 1  ;;  %v103_v32 = vadd.f32 1.0, %v102_v22 }
   0xe   :  { %v416_v42 = vrot.slane %v103_v32, 9 }
  0x10   :  { %451 = vset.pattern.permute.xlu1 %v565_v3  ;;  %v108_v47 = vmul.f32 %v416_v42, %v103_v32 }
  0x11   :  { %57 = vperm.xlu1 %451, %v34_v0   ;;  %453 = vset.pattern.permute.xlu2 %v567_v7 }
  0x12   :  { %85 = vperm.xlu2 %453, %v34_v0   ;;  %v120_v52 = vperm.slane %v108_v47, 2  ;;  %v121_v53 = vperm.slane %v108_v47, 6  ;;  %v569_v47 = vmov 0.0  }
  0x14   :  { %v124_v58 = vperm.slane %v120_v52, 2  ;;  %v125_v59 = vperm.slane %v121_v53, 2 }
  0x63   :  { %v74_v11 = vpop.permute.xlu2 %73 }
  0x64   :  { %v76_v34 = vmin.f32 %v70_v23, %v74_v11  ;;  %v77_v39 = vmin.f32 %v71_v28, %v74_v11 }
  0x6c   :  { %v86_v33 = vpop.permute.xlu2 %85 }
  0x6d   :  { %v88_v40 = vmax.f32 %v82_v29, %v86_v33  ;;  %v89_v41 = vmax.f32 %v83_v30, %v86_v33  ;;  %v169_v33 = vlaneseq }
  0x6f   :  { %v90_v45 = vsub.f32 %v76_v34, %v88_v40  ;;  %v91_v46 = vsub.f32 %v77_v39, %v89_v41 }
  0x71   :  { %v92_v50 = vadd.f32 1.0, %v90_v45  ;;  %v93_v51 = vadd.f32 1.0, %v91_v46 }
  0x73   :  { %v96_v56 = vmax.f32 %v92_v50, 0.0  ;;  %v97_v57 = vmax.f32 %v93_v51, 0.0 }
  0x79   :  { %v110_v4 = vpop.permute.xlu0 %109 }
  0x7a   :  { %v112_v5 = vsub.f32 %v34_v0, %v110_v4  ;;  %v46_v10 = vpop.permute.xlu1 %45 }
  0x7b   :  { %v48_v35 = vmin.f32 %v41_v24, %v46_v10  ;;  %v49_v36 = vmin.f32 %v42_v25, %v46_v10 }
  0x7c   :  { %v113_v6 = vadd.f32 1.0, %v112_v5 }
  0x7e   :  { %115 = vrot.lane.b32.xlu0 %v113_v6, %s566_s2 }
  0x83   :  { %v58_v31 = vpop.permute.xlu1 %57 }
  0x84   :  { %v60_v37 = vmax.f32 %v54_v26, %v58_v31  ;;  %v61_v38 = vmax.f32 %v55_v27, %v58_v31 }
  0x86   :  { %v62_v43 = vsub.f32 %v48_v35, %v60_v37  ;;  %v63_v44 = vsub.f32 %v49_v36, %v61_v38  ;;  %v614_v38 = vshrl.u32 %v169_v33, 7 }
  0x88   :  { %v64_v48 = vadd.f32 1.0, %v62_v43  ;;  %v65_v49 = vadd.f32 1.0, %v63_v44 }
  0x8a   :  { %v94_v54 = vmax.f32 %v64_v48, 0.0  ;;  %v95_v55 = vmax.f32 %v65_v49, 0.0 }
  0x8c   :  { %v98_v61 = vmul.f32 %v96_v56, %v94_v54  ;;  %v99_v62 = vmul.f32 %v97_v57, %v95_v55 }
  0x8e   :  { %vm135_vm8 = vcmp.gt.f32.partialorder %v98_v61, 0.0  ;;  %vm136_vm9 = vcmp.gt.f32.partialorder %v99_v62, 0.0 }
  0xf0   :  { %v116_v8 = vpop.permute.xlu0 %115 }
  0xf1   :  { %v118_v9 = vmul.f32 %v116_v8, %v113_v6 }
  0xf3   :  { %128 = vperm.xlu0 %454, %v118_v9  }
 0x165   :  { %v129_v60 = vpop.permute.xlu0 %128 }
 0x166   :  { %v131_v63 = vadd.f32 %v129_v60, %v124_v58  ;;  %v132_v0 = vadd.f32 %v129_v60, %v125_v59 }
 0x168   :  { %v133_v1 = vsub.f32 %v131_v63, %v98_v61  ;;  %v134_v2 = vsub.f32 %v132_v0, %v99_v62  ;;  %v570_v0 = vmov 1.0  }
 0x16a   :  { %455 = vrcp.f32 %v133_v1  ;;  %v148_v9 = vand.u32 2147483648, %v133_v1  ;;  %v146_v12 = vand.u32 2147483647, %v133_v1  ;;  %v162_v13 = vand.u32 2147483648, %v134_v2 }
 0x16b   :  { %457 = vrcp.f32 %v134_v2  ;;  %v160_v15 = vand.u32 2147483647, %v134_v2  ;;  %vm142_vm2 = vweird.f32 %v133_v1  ;;  %vm156_vm4 = vweird.f32 %v134_v2 }
 0x16c   :  { %v149_v17 = vor.u32 1.1754944e-38, %v148_v9  ;;  %vm147_vm5 = vcmp.eq.f32.partialorder %v146_v12, 8.507059e+37  ;;  %v163_v19 = vor.u32 1.1754944e-38, %v162_v13 }
 0x16d   :  { %vm161_vm7 = vcmp.eq.f32.partialorder %v160_v15, 8.507059e+37 }
 0x170   :  { %v456_v4 = vpop.eup %455 }
 0x171   :  { %v458_v5 = vpop.eup %457  ;;  %v138_v6 = vmul.f32 %v456_v4, %v133_v1  ;;  %vm143_vm0 = vweird.f32 %v456_v4 }
 0x172   :  { %v152_v7 = vmul.f32 %v458_v5, %v134_v2  ;;  %vm157_vm1 = vweird.f32 %v458_v5  ;;  %vm144_vm3 = vmor %vm142_vm2, %vm143_vm0  ;;  %vm568_vm0 = vmmov 1  }
 0x173   :  { %v139_v8 = vsub.f32 1.0, %v138_v6  ;;  %vm158_vm6 = vmor %vm156_vm4, %vm157_vm1 }
 0x174   :  { %v153_v10 = vsub.f32 1.0, %v152_v7 }
 0x175   :  { %v140_v11 = vmul.f32 %v456_v4, %v139_v8 }
 0x176   :  { %v154_v14 = vmul.f32 %v458_v5, %v153_v10 }
 0x177   :  { %v141_v16 = vadd.f32 %v456_v4, %v140_v11 }
 0x178   :  { %v155_v18 = vadd.f32 %v458_v5, %v154_v14 }
 0x179   :  { %v145_v20 = vsel %vm144_vm3, %v456_v4, %v141_v16 }
 0x17a   :  { %v150_v21 = vsel %vm147_vm5, %v149_v17, %v145_v20  ;;  %v159_v22 = vsel %vm158_vm6, %v458_v5, %v155_v18 }
 0x17b   :  { %v165_v23 = vmul.f32 %v150_v21, %v98_v61  ;;  %v164_v24 = vsel %vm161_vm7, %v163_v19, %v159_v22  ;;  %vm358_vm7 = vcmask 1040384  }
 0x17c   :  { %v166_v25 = vmul.f32 %v164_v24, %v99_v62  ;;  %v35_v62 = vld [vmem:[#allocation2] sm:$0x3f] }
 0x17d   :  { %v167_v26 = vsel %vm135_vm8, %v165_v23, 0.0  ;;  %vm363_vm8 = vcmp.lt.s32.totalorder %v169_v33, 256 }
 0x17e   :  { %v171_v27 = vrot.slane %v167_v26, 4  ;;  %v168_v28 = vsel %vm136_vm9, %v166_v25, 0.0 }
 0x17f   :  { %v177_v29 = vrot.slane %v168_v28, 4 }
 0x180   :  { %v172_v30 = vmax.f32 %v167_v26, %v171_v27 }
 0x181   :  { %v178_v31 = vmax.f32 %v168_v28, %v177_v29 }
 0x182   :  { %v173_v32 = vrot.slane %v172_v30, 2 }
 0x183   :  { %v179_v34 = vrot.slane %v178_v31, 2 }
 0x184   :  { %v174_v35 = vmax.f32 %v172_v30, %v173_v32 }
 0x185   :  { %v180_v36 = vmax.f32 %v178_v31, %v179_v34 }
 0x186   :  { %v175_v37 = vrot.slane %v174_v35, 1 }
 0x187   :  { %v181_v39 = vrot.slane %v180_v36, 1 }
 0x188   :  { %v616_v40 = vmax.f32 %v174_v35, %v175_v37 }
 0x189   :  { %v618_v41 = vmax.f32 %v180_v36, %v181_v39 }
 0x18a   :  { %vm183_vm10 = vcmp.eq.f32.partialorder %v167_v26, %v616_v40  ;;  %vm255_vm11 = vcmp.ge.f32.partialorder %v616_v40, 0.5  ;;  %vm257_vm12 = vcmp.gt.f32.partialorder %v616_v40, 0.4 }
 0x18b   :  { %v185_v42 = vsel %vm183_vm10, %v614_v38, 8  ;;  %vm184_vm13 = vcmp.eq.f32.partialorder %v168_v28, %v618_v41  ;;  %vm256_vm14 = vcmp.ge.f32.partialorder %v618_v41, 0.5  ;;  %vm258_vm15 = vcmp.gt.f32.partialorder %v618_v41, 0.4  ;;  %vm259_vm1 = vmxor %vm255_vm11, %vm568_vm0 }
 0x18c   :  { %v187_v43 = vrot.slane %v185_v42, 4  ;;  %v186_v44 = vsel %vm184_vm13, %v614_v38, 8  ;;  %vm260_vm2 = vmxor %vm256_vm14, %vm568_vm0 }
 0x18d   :  { %v196_v45 = vrot.slane %v186_v44, 4  ;;  %vm261_vm3 = vmand %vm257_vm12, %vm259_vm1 }
 0x18e   :  { %vm188_vm4 = vcmp.lt.s32.totalorder %v185_v42, %v187_v43  ;;  %vm262_vm5 = vmand %vm258_vm15, %vm260_vm2  ;;  %v263_v48 = vsel %vm261_vm3, -1.0, %v569_v47  ;;  %vm211_vm15 = vcmask 64512  }
 0x18f   :  { %v189_v46 = vsel %vm188_vm4, %v185_v42, %v187_v43  ;;  %vm197_vm6 = vcmp.lt.s32.totalorder %v186_v44, %v196_v45  ;;  %v264_v49 = vsel %vm262_vm5, -1.0, %v569_v47  ;;  %v265_v55 = vsel %vm255_vm11, 1.0, %v263_v48 }
 0x190   :  { %v190_v50 = vrot.slane %v189_v46, 2  ;;  %v198_v51 = vsel %vm197_vm6, %v186_v44, %v196_v45  ;;  %v266_v52 = vsel %vm256_vm14, 1.0, %v264_v49 }
 0x191   :  { %v199_v53 = vrot.slane %v198_v51, 2  ;;  %v357_v54 = vrot.slane %v266_v52, 7 }
 0x192   :  { %vm191_vm9 = vcmp.lt.s32.totalorder %v189_v46, %v190_v50 }
 0x193   :  { %v192_v56 = vsel %vm191_vm9, %v189_v46, %v190_v50  ;;  %vm200_vm10 = vcmp.lt.s32.totalorder %v198_v51, %v199_v53  ;;  %v359_v57 = vsel %vm358_vm7, %v265_v55, %v357_v54 }
 0x194   :  { %v193_v58 = vrot.slane %v192_v56, 1  ;;  %v201_v59 = vsel %vm200_vm10, %v198_v51, %v199_v53  ;;  %365 = vst.msk [vmem:[#allocation6] sm:$0x3] %vm363_vm8, %v359_v57 }
 0x195   :  { %v202_v60 = vrot.slane %v201_v59, 1  ;;  %389 = dma.vmem_to_hbm [thread:$0]  %s385_s30, 32, %s387_s28, [#allocation7]  }
 0x196   :  { %vm194_vm12 = vcmp.lt.s32.totalorder %v192_v56, %v193_v58 }
 0x197   :  { %v195_v61 = vsel %vm194_vm12, %v192_v56, %v193_v58  ;;  %vm203_vm13 = vcmp.lt.s32.totalorder %v201_v59, %v202_v60 }
 0x198   :  { %vm205_vm0 = vcmp.eq.s32.totalorder %v614_v38, %v195_v61  ;;  %v204_v63 = vsel %vm203_vm13, %v201_v59, %v202_v60 }
 0x199   :  { %419 = vmatpush.msk.msra.mxu0 %vm205_vm0, %v570_v0  ;;  %vm206_vm1 = vcmp.eq.s32.totalorder %v614_v38, %v204_v63 }
 0x19a   :  { %421 = vmatpush.msk.msra.mxu1 %vm206_vm1, %v570_v0  ;;  %420 = vmatmul.msk.f32.vlgmr.msra.gmra.mxu0 %vm211_vm15, %v35_v62 }
 0x19b   :  { %422 = vmatmul.msk.f32.vlgmr.msra.gmra.mxu1 %vm211_vm15, %v35_v62 }
 0x217   :  { %v232_v1 = vpop.f32.mrf.mxu0 }
 0x218   :  { %vm427_vm2 = vcmp.lt.s32.totalorder %v232_v1, 0  ;;  %v428_v2 = vceil.f32 %v232_v1  ;;  %v429_v4 = vfloor.f32 %v232_v1  ;;  %366 = vst [vmem:[#allocation8] sm:$0x3f] %v232_v1  ;;  %v252_v5 = vpop.f32.mrf.mxu1 }
 0x219   :  { %vm432_vm3 = vcmp.lt.s32.totalorder %v252_v5, 0  ;;  %v433_v6 = vceil.f32 %v252_v5  ;;  %v434_v7 = vfloor.f32 %v252_v5  ;;  %367 = vst [vmem:[#allocation8 + $0x8] sm:$0x3f] %v252_v5 }
 0x21a   :  { %v430_v8 = vsel %vm427_vm2, %v428_v2, %v429_v4  ;;  %400 = dma.vmem_to_hbm [thread:$0]  %s396_s7, 256, %s398_s10, [#allocation7]  }
 0x21b   :  { %v431_v9 = vcvt.f32.s32 %v430_v8  ;;  %v435_v10 = vsel %vm432_vm3, %v433_v6, %v434_v7 }
 0x21c   :  { %v436_v11 = vcvt.f32.s32 %v435_v10 }
 0x21d   :  { %v423_v12 = vadd.s32 4294967295, %v431_v9 }
 0x21e   :  { %v424_v13 = vadd.s32 4294967295, %v436_v11 }
 0x21f   :  { %vm271_vm4 = vcmp.lt.s32.totalorder %v423_v12, 0  ;;  %v272_v14 = vsub.s32 0, %v423_v12 }
 0x220   :  { %vm300_vm5 = vcmp.lt.s32.totalorder %v424_v13, 0  ;;  %v301_v15 = vsub.s32 0, %v424_v13 }
 0x221   :  { %v273_v16 = vsel %vm271_vm4, %v272_v14, %v423_v12 }
 0x222   :  { %v274_v17 = vand.u32 65535, %v273_v16  ;;  %v275_v18 = vshrl.u32 %v273_v16, 16  ;;  %v302_v19 = vsel %vm300_vm5, %v301_v15, %v424_v13 }
 0x223   :  { %v303_v20 = vand.u32 65535, %v302_v19  ;;  %v304_v21 = vshrl.u32 %v302_v19, 16 }
 0x224   :  { %v278_v22 = vmul.u32 52428, %v274_v17  ;;  %v279_v23 = vmul.u32 52429, %v275_v18  ;;  %v277_v26 = vmul.u32 52429, %v274_v17  ;;  %v280_v28 = vmul.u32 52428, %v275_v18 }
 0x225   :  { %v307_v24 = vmul.u32 52428, %v303_v20  ;;  %v308_v25 = vmul.u32 52429, %v304_v21  ;;  %v306_v29 = vmul.u32 52429, %v303_v20  ;;  %v309_v33 = vmul.u32 52428, %v304_v21 }
 0x226   :  { %v281_v27 = vshll.u32 %v278_v22, 16  ;;  %v283_v31 = vshll.u32 %v279_v23, 16  ;;  %v282_v44 = vshrl.u32 %v278_v22, 16  ;;  %v284_v50 = vshrl.u32 %v279_v23, 16 }
 0x227   :  { %v310_v30 = vshll.u32 %v307_v24, 16  ;;  %v312_v35 = vshll.u32 %v308_v25, 16  ;;  %v311_v48 = vshrl.u32 %v307_v24, 16  ;;  %v313_v52 = vshrl.u32 %v308_v25, 16 }
 0x228   :  { %vm285_vm6 = vc.u32 %v277_v26, %v281_v27  ;;  %v287_v32 = vadd.s32 %v281_v27, %v277_v26 }
 0x229   :  { %v286_v34 = vsel %vm285_vm6, 1, %v565_v3  ;;  %vm314_vm7 = vc.u32 %v306_v29, %v310_v30  ;;  %v316_v36 = vadd.s32 %v310_v30, %v306_v29 }
 0x22a   :  { %v288_v37 = vadd.s32 %v286_v34, %v280_v28  ;;  %vm289_vm8 = vc.u32 %v287_v32, %v283_v31  ;;  %v315_v39 = vsel %vm314_vm7, 1, %v565_v3 }
 0x22b   :  { %v290_v42 = vsel %vm289_vm8, 1, %v565_v3  ;;  %v317_v43 = vadd.s32 %v315_v39, %v309_v33  ;;  %vm318_vm9 = vc.u32 %v316_v36, %v312_v35 }
 0x22c   :  { %v292_v45 = vadd.s32 %v290_v42, %v288_v37  ;;  %v319_v46 = vsel %vm318_vm9, 1, %v565_v3 }
 0x22d   :  { %v321_v49 = vadd.s32 %v319_v46, %v317_v43 }
 0x22e   :  { %v293_v51 = vadd.s32 %v292_v45, %v282_v44 }
 0x22f   :  { %v322_v53 = vadd.s32 %v321_v49, %v311_v48 }
 0x230   :  { %v294_v54 = vadd.s32 %v293_v51, %v284_v50 }
 0x231   :  { %v323_v55 = vadd.s32 %v322_v53, %v313_v52 }
 0x232   :  { %v295_v56 = vshrl.u32 %v294_v54, 2 }
 0x233   :  { %v324_v57 = vshrl.u32 %v323_v55, 2 }
 0x234   :  { %v296_v58 = vmul.u32 5, %v295_v56 }
 0x235   :  { %v325_v59 = vmul.u32 5, %v324_v57 }
 0x236   :  { %v297_v60 = vsub.s32 %v273_v16, %v296_v58 }
 0x237   :  { %v326_v61 = vsub.s32 %v302_v19, %v325_v59 }
 0x238   :  { %v298_v62 = vsub.s32 0, %v297_v60 }
 0x239   :  { %v327_v63 = vsub.s32 0, %v326_v61 }
 0x23a   :  { %v299_v0 = vsel %vm271_vm4, %v298_v62, %v297_v60 }
 0x23b   :  { %v328_v3 = vsel %vm300_vm5, %v327_v63, %v326_v61  ;;  %vm329_vm10 = vcmp.ne.s32.totalorder %v299_v0, 0  ;;  %vm331_vm12 = vcmp.lt.s32.totalorder %v299_v0, 0  ;;  %v335_v1 = vadd.s32 5, %v299_v0 }
 0x23c   :  { %vm330_vm13 = vcmp.ne.s32.totalorder %v328_v3, 0  ;;  %vm332_vm15 = vcmp.lt.s32.totalorder %v328_v3, 0  ;;  %vm333_vm0 = vmand %vm331_vm12, %vm329_vm10  ;;  %v336_v2 = vadd.s32 5, %v328_v3 }
 0x23d   :  { %vm334_vm1 = vmand %vm332_vm15, %vm330_vm13  ;;  %v337_v4 = vsel %vm333_vm0, %v335_v1, %v299_v0 }
 0x23e   :  { %v338_v5 = vsel %vm334_vm1, %v336_v2, %v328_v3  ;;  %v339_v6 = vperm.slane %v337_v4, 5 }
 0x23f   :  { %v340_v7 = vperm.slane %v338_v5, 5 }
 0x240   :  { %vm341_vm2 = vcmp.eq.s32.totalorder %v614_v38, %v339_v6 }
 0x241   :  { %vm342_vm3 = vcmp.eq.s32.totalorder %v614_v38, %v340_v7  ;;  %vm347_vm4 = vmand %vm341_vm2, %vm255_vm11 }
 0x242   :  { %vm348_vm5 = vmand %vm342_vm3, %vm256_vm14  ;;  %v425_v8 = vsel %vm347_vm4, 1.0, %v569_v47 }
 0x243   :  { %v426_v9 = vsel %vm348_vm5, 1.0, %v569_v47  ;;  %353 = vst [vmem:[#allocation5] sm:$0x1f] %v425_v8 }
 0x244   :  { %354 = vst [vmem:[#allocation5 + $0x8] sm:$0x1f] %v426_v9 }
 0x245   :  { %378 = dma.vmem_to_hbm [thread:$0]  %s374_s5, 256, %s376_s13, [#allocation4]  }
 0x246   :  { %557 = dma.done.wait [#allocation4], 256  }
 0x247   :  { %558 = vsyncadd [#allocation4], 4294967040 }
 0x248   :  { %559 = dma.done.wait [#allocation7], 288  }
 0x249   :  { %560 = vsyncadd [#allocation7], 4294967008 }
 0x24a   :  { %413 = vsyncpa [#allocation3], 1 }
 0x24b   :  { %414 = vsyncpa [#allocation4], 1 }
 0x24c   :  { %415 = vsyncpa [#allocation7], 1 }

</bundles_post_ra>
